<compile_context>
chip_gen: v7x
topology: tpu7x:2x2x1
jax: 0.10.0
libtpu: 0.0.40
codegen_flags: <defaults>
</compile_context>

<pallas_src>
import functools

import jax
import jax.numpy as jnp
from jax import lax
from jax.experimental import pallas as pl
from jax.experimental.pallas import tpu as pltpu

EPS = 1e-5  # torch.nn.LayerNorm default eps

# Packed small-parameter rows (all padded to width F):
#   0: conv1 bias   1: ln1 gamma   2: ln1 beta
#   3: conv2 bias   4: ln2 gamma   5: ln2 beta
#   6: linear weight (F -> 1)      7: bins (padded with +FLT_MAX)
#   8: linear bias  (at [8, 0])    9: control scalar (at [9, 0])


def _variance_encoder_kernel(
    x_ref, mask_ref, tgt_ref,
    w1_ref, w2_ref, emb_ref, pvec_ref,
    pred_ref, emb_out_ref,
    *, use_tgt: bool, kernel_size: int):
    x = x_ref[0]                              # (Bb, T, H)
    Bb, T, H = x.shape
    F = w1_ref.shape[1]
    N = Bb * T
    pad = (kernel_size - 1) // 2

    def conv_relu_ln(h, w_flat_ref, bias, gamma, beta):
        # h: (Bb, T, Cin); w_flat_ref: (K*Cin, F)  -> one im2col matmul.
        cin = h.shape[-1]
        if pad > 0:
            z = jnp.zeros((Bb, pad, cin), jnp.float32)
            hp = jnp.concatenate([z, h, z], axis=1)          # (Bb, T+K-1, Cin)
        else:
            hp = h
        cols = jnp.concatenate(
            [hp[:, k:k + T, :] for k in range(kernel_size)], axis=-1)  # (Bb, T, K*Cin)
        cols = cols.reshape(N, kernel_size * cin)
        w = w_flat_ref[...]
        out = jnp.dot(cols.astype(w.dtype), w, preferred_element_type=jnp.float32)
        out = jnp.maximum(out + bias, 0.0)                   # conv bias + ReLU
        mu = jnp.mean(out, axis=-1, keepdims=True)
        var = jnp.mean((out - mu) ** 2, axis=-1, keepdims=True)
        out = (out - mu) * lax.rsqrt(var + EPS) * gamma + beta
        return out.reshape(Bb, T, F)

    # --- VariancePredictor (nn.Dropout is identity in eval mode) ---
    h = conv_relu_ln(x, w1_ref, pvec_ref[0:1, :], pvec_ref[1:2, :], pvec_ref[2:3, :])
    h = conv_relu_ln(h, w2_ref, pvec_ref[3:4, :], pvec_ref[4:5, :], pvec_ref[5:6, :])

    h_flat = h.reshape(N, F)
    pred = (jnp.sum(h_flat * pvec_ref[6:7, :], axis=-1, keepdims=True)
            + pvec_ref[8:9, 0:1])                            # (N, 1)
    pred = jnp.where(mask_ref[0] > 0.5, 0.0, pred)           # masked_fill

    # --- VarianceEncoder head ---
    if use_tgt:
        values = tgt_ref[0]                                  # (N, 1)
    else:
        pred = pred * pvec_ref[9:10, 0:1]                    # prediction * control
        values = pred

    # torch.bucketize(v, bins, right=False) == count(bins < v); padded bin
    # entries are +FLT_MAX so they never count.
    idx = jnp.sum((values > pvec_ref[7:8, :]).astype(jnp.int32),
                  axis=-1, keepdims=True)                    # (N, 1)

    # embedding lookup as one-hot @ table (MXU-friendly gather), once per block
    n_bins = emb_ref.shape[0]
    onehot = (idx == lax.broadcasted_iota(jnp.int32, (N, n_bins), 1)).astype(jnp.float32)
    emb = jnp.dot(onehot, emb_ref[...], preferred_element_type=jnp.float32)  # (N, H)

    pred_ref[0] = pred.reshape(1, N)                         # lane-dense store
    emb_out_ref[0] = emb.reshape(Bb, T, H)


def _pack_small_params(params, control, F):
    nb_m1 = params["bins"].shape[1]
    assert nb_m1 <= F, "bins must fit into one packed row of width F"
    big = float(jnp.finfo(jnp.float32).max)
    bins_row = jnp.pad(params["bins"], ((0, 0), (0, F - nb_m1)), constant_values=big)
    bl_row = jnp.pad(params["bl"], ((0, 0), (0, F - 1)))
    ctrl_row = jnp.pad(jnp.full((1, 1), control, jnp.float32), ((0, 0), (0, F - 1)))
    return jnp.concatenate(
        [params["b1"], params["g1"], params["be1"],
         params["b2"], params["g2"], params["be2"],
         params["wl"], bins_row, bl_row, ctrl_row], axis=0)   # (10, F)


def variance_encoder_forward(params, x, tgt, mask, control, *, block_b=None):
    """x: (B,T,H) f32; tgt: (B,T) f32 or None; mask: (B,T) bool; control: float."""
    B, T, H = x.shape
    K, _, F = params["w1"].shape
    NB = params["emb"].shape[0]
    use_tgt = tgt is not None

    # Batch many sequences per grid step, but keep >= 2 grid steps when B >= 2
    # so both v7x TensorCores get work (dimension_semantics=("parallel",)).
    if block_b is None:
        block_b = min(32, pl.cdiv(B, 2)) if B >= 2 else B
    block_b = max(1, min(block_b, B))
    G = pl.cdiv(B, block_b)
    Bp = G * block_b

    def pad_b(a):
        if Bp == B:
            return a
        return jnp.pad(a, ((0, Bp - B),) + ((0, 0),) * (a.ndim - 1))

    x_in = pad_b(x).reshape(G, block_b, T, H)
    mask_in = pad_b(mask.astype(jnp.float32)).reshape(G, block_b * T, 1)
    tgt_arr = (tgt if use_tgt else jnp.zeros((B, T), jnp.float32)).astype(jnp.float32)
    tgt_in = pad_b(tgt_arr).reshape(G, block_b * T, 1)

    w1_flat = params["w1"].reshape(K * H, F)     # (K*Cin, Cout) for im2col matmul
    w2_flat = params["w2"].reshape(K * F, F)
    pvec = _pack_small_params(params, control, F)

    kern = functools.partial(_variance_encoder_kernel,
                             use_tgt=use_tgt, kernel_size=K)

    in_specs = [
        pl.BlockSpec((1, block_b, T, H), lambda b: (b, 0, 0, 0)),   # x
        pl.BlockSpec((1, block_b * T, 1), lambda b: (b, 0, 0)),     # mask
        pl.BlockSpec((1, block_b * T, 1), lambda b: (b, 0, 0)),     # tgt
        pl.BlockSpec((K * H, F), lambda b: (0, 0)),                 # conv1 weight (im2col)
        pl.BlockSpec((K * F, F), lambda b: (0, 0)),                 # conv2 weight (im2col)
        pl.BlockSpec((NB, H), lambda b: (0, 0)),                    # embedding table
        pl.BlockSpec((10, F), lambda b: (0, 0)),                    # packed small params
    ]
    out_specs = [
        pl.BlockSpec((1, 1, block_b * T), lambda b: (b, 0, 0)),     # prediction (lane-dense)
        pl.BlockSpec((1, block_b, T, H), lambda b: (b, 0, 0, 0)),   # embedding
    ]
    out_shape = [
        jax.ShapeDtypeStruct((G, 1, block_b * T), jnp.float32),
        jax.ShapeDtypeStruct((G, block_b, T, H), jnp.float32),
    ]

    pred, emb = pl.pallas_call(
        kern,
        grid=(G,),
        in_specs=in_specs,
        out_specs=out_specs,
        out_shape=out_shape,
        compiler_params=pltpu.CompilerParams(dimension_semantics=("parallel",)),
    )(x_in, mask_in, tgt_in, w1_flat, w2_flat, params["emb"], pvec)

    pred = pred.reshape(Bp, T)[:B]
    emb = emb.reshape(Bp, T, H)[:B]
    return pred, emb


def variance_encoder_ref(params, x, tgt, mask, control):
    """Pure-JAX reference mirroring the PyTorch forward (eval mode)."""
    def conv1d(h, w, b):
        out = lax.conv_general_dilated(h, w, window_strides=(1,), padding="SAME",
                                       dimension_numbers=("NWC", "WIO", "NWC"))
        return out + b[0]

    def ln(h, g, b):
        mu = jnp.mean(h, -1, keepdims=True)
        var = jnp.mean((h - mu) ** 2, -1, keepdims=True)
        return (h - mu) / jnp.sqrt(var + EPS) * g[0] + b[0]

    h = ln(jax.nn.relu(conv1d(x, params["w1"], params["b1"])), params["g1"], params["be1"])
    h = ln(jax.nn.relu(conv1d(h, params["w2"], params["b2"])), params["g2"], params["be2"])
    pred = jnp.sum(h * params["wl"][0], -1) + params["bl"][0, 0]
    pred = jnp.where(mask, 0.0, pred)
    if tgt is not None:
        values = tgt
    else:
        pred = pred * control
        values = pred
    bins = params["bins"][0]
    idx = jnp.sum(values[..., None] > bins, axis=-1)
    return pred, params["emb"][idx]


if __name__ == "__main__":
    # config: encoder_hidden=32, variance_filter_size=32, variance_kernel=3,
    # variance_nbins=16 (filter_size == encoder_hidden so the 2nd Conv1d,
    # declared with in_channels=encoder_hidden, typechecks as in the module).
    T, H = 8, 32
    F, K, NB = 32, 3, 16

    key = jax.random.PRNGKey(0)
    ks = jax.random.split(key, 12)
    params = dict(
        w1=0.2 * jax.random.normal(ks[0], (K, H, F), jnp.float32),
        b1=0.1 * jax.random.normal(ks[1], (1, F), jnp.float32),
        g1=1.0 + 0.1 * jax.random.normal(ks[2], (1, F), jnp.float32),
        be1=0.1 * jax.random.normal(ks[3], (1, F), jnp.float32),
        w2=0.2 * jax.random.normal(ks[4], (K, F, F), jnp.float32),
        b2=0.1 * jax.random.normal(ks[5], (1, F), jnp.float32),
        g2=1.0 + 0.1 * jax.random.normal(ks[6], (1, F), jnp.float32),
        be2=0.1 * jax.random.normal(ks[7], (1, F), jnp.float32),
        wl=0.3 * jax.random.normal(ks[8], (1, F), jnp.float32),
        bl=0.1 * jax.random.normal(ks[9], (1, 1), jnp.float32),
        bins=jnp.linspace(-1.0, 1.0, NB - 1).astype(jnp.float32)[None, :],
        emb=0.5 * jax.random.normal(ks[10], (NB, H), jnp.float32),
    )
    control = 1.3

    def check(B):
        kx, kt = jax.random.split(jax.random.fold_in(key, B))
        x = jax.random.normal(kx, (B, T, H), jnp.float32)
        lengths = jnp.maximum(T - (jnp.arange(B) % T), 1)
        mask = jnp.arange(T)[None, :] >= lengths[:, None]      # True = padded position
        tgt = jax.random.uniform(kt, (B, T), jnp.float32, -1.2, 1.2)

        # Branch 1: teacher-forced (tgt provided -> bucketize tgt)
        p1, e1 = variance_encoder_forward(params, x, tgt, mask, control)
        # Branch 2: inference (tgt=None -> prediction * control is bucketized)
        p2, e2 = variance_encoder_forward(params, x, None, mask, control)
        jax.block_until_ready((p1, e1, p2, e2))

        rp1, re1 = variance_encoder_ref(params, x, tgt, mask, control)
        rp2, re2 = variance_encoder_ref(params, x, None, mask, control)
        assert jnp.allclose(p1, rp1, atol=1e-4), f"prediction mismatch (tgt), B={B}"
        assert jnp.allclose(e1, re1, atol=1e-4), f"embedding mismatch (tgt), B={B}"
        assert jnp.allclose(p2, rp2, atol=1e-4), f"prediction mismatch (ctrl), B={B}"
        assert jnp.allclose(e2, re2, atol=1e-4), f"embedding mismatch (ctrl), B={B}"

    check(2)   # block_b=1, grid=2  (keeps both v7x TensorCores busy)
    check(5)   # block_b=3, grid=2  (exercises the batched + padded-batch path)
    print("KERNEL_OK")
</pallas_src>

<mosaic_0001>
module attributes {stable_mosaic.version = 11 : i64} {
  func.func @_variance_encoder_kernel(%arg0: i32, %arg1: memref<1x1x8x32xf32, #tpu.memory_space<vmem>>, %arg2: memref<1x8x1xf32, #tpu.memory_space<vmem>>, %arg3: memref<1x8x1xf32, #tpu.memory_space<vmem>>, %arg4: memref<96x32xf32, #tpu.memory_space<vmem>>, %arg5: memref<96x32xf32, #tpu.memory_space<vmem>>, %arg6: memref<16x32xf32, #tpu.memory_space<vmem>>, %arg7: memref<10x32xf32, #tpu.memory_space<vmem>>, %arg8: memref<1x1x8xf32, #tpu.memory_space<vmem>>, %arg9: memref<1x1x8x32xf32, #tpu.memory_space<vmem>>) attributes {dimension_semantics = [#tpu.dimension_semantics<parallel>], iteration_bounds = array<i64: 2>, scalar_prefetch = 0 : i64, scratch_operands = 0 : i64, tpu.core_type = #tpu.core_type<tc>, window_params = [{transform_indices = @transform_0, window_bounds = array<i64: 1, 1, 8, 32>}, {transform_indices = @transform_1, window_bounds = array<i64: 1, 8, 1>}, {transform_indices = @transform_2, window_bounds = array<i64: 1, 8, 1>}, {pipeline_mode = #tpu.pipeline_mode<synchronous>, transform_indices = @transform_3, window_bounds = array<i64: 96, 32>}, {pipeline_mode = #tpu.pipeline_mode<synchronous>, transform_indices = @transform_4, window_bounds = array<i64: 96, 32>}, {pipeline_mode = #tpu.pipeline_mode<synchronous>, transform_indices = @transform_5, window_bounds = array<i64: 16, 32>}, {pipeline_mode = #tpu.pipeline_mode<synchronous>, transform_indices = @transform_6, window_bounds = array<i64: 10, 32>}, {transform_indices = @transform_7, window_bounds = array<i64: 1, 1, 8>}, {transform_indices = @transform_8, window_bounds = array<i64: 1, 1, 8, 32>}]} {
    %c0 = arith.constant 0 : index
    %c0_0 = arith.constant 0 : index
    %c0_1 = arith.constant 0 : index
    %c0_2 = arith.constant 0 : index
    %0 = vector.load %arg1[%c0, %c0_0, %c0_1, %c0_2] : memref<1x1x8x32xf32, #tpu.memory_space<vmem>>, vector<1x1x8x32xf32>
    %1 = vector.shape_cast %0 : vector<1x1x8x32xf32> to vector<1x8x32xf32>
    %c0_3 = arith.constant 0 : index
    %c0_4 = arith.constant 0 : index
    %2 = vector.load %arg7[%c0_3, %c0_4] : memref<10x32xf32, #tpu.memory_space<vmem>>, vector<1x32xf32>
    %c1 = arith.constant 1 : index
    %c0_5 = arith.constant 0 : index
    %3 = vector.load %arg7[%c1, %c0_5] : memref<10x32xf32, #tpu.memory_space<vmem>>, vector<1x32xf32>
    %c2 = arith.constant 2 : index
    %c0_6 = arith.constant 0 : index
    %4 = vector.load %arg7[%c2, %c0_6] : memref<10x32xf32, #tpu.memory_space<vmem>>, vector<1x32xf32>
    %cst = arith.constant 0.000000e+00 : f32
    %5 = vector.broadcast %cst : f32 to vector<1x1x32xf32>
    %6 = tpu.concatenate %5, %1, %5 in 1 : vector<1x1x32xf32>, vector<1x8x32xf32>, vector<1x1x32xf32> -> vector<1x10x32xf32>
    %7 = vector.extract_strided_slice %6 {offsets = [0, 0, 0], sizes = [1, 8, 32], strides = [1, 1, 1]} : vector<1x10x32xf32> to vector<1x8x32xf32>
    %8 = vector.extract_strided_slice %6 {offsets = [0, 1, 0], sizes = [1, 8, 32], strides = [1, 1, 1]} : vector<1x10x32xf32> to vector<1x8x32xf32>
    %9 = vector.extract_strided_slice %6 {offsets = [0, 2, 0], sizes = [1, 8, 32], strides = [1, 1, 1]} : vector<1x10x32xf32> to vector<1x8x32xf32>
    %10 = tpu.concatenate %7, %8, %9 in 2 : vector<1x8x32xf32>, vector<1x8x32xf32>, vector<1x8x32xf32> -> vector<1x8x96xf32>
    %11 = vector.shape_cast %10 : vector<1x8x96xf32> to vector<8x96xf32>
    %c0_7 = arith.constant 0 : index
    %c0_8 = arith.constant 0 : index
    %12 = vector.load %arg4[%c0_7, %c0_8] : memref<96x32xf32, #tpu.memory_space<vmem>>, vector<96x32xf32>
    %cst_9 = arith.constant dense<0.000000e+00> : vector<8x32xf32>
    %13 = tpu.matmul %11, %12, %cst_9 {dimension_numbers = #tpu.dot_dimension_numbers<[1], [0], [0], [1], [0, 0, 1, 1], [], []>} : vector<8x96xf32>, vector<96x32xf32>, vector<8x32xf32> -> vector<8x32xf32>
    %14 = vector.broadcast %2 : vector<1x32xf32> to vector<8x32xf32>
    %15 = arith.addf %13, %14 : vector<8x32xf32>
    %cst_10 = arith.constant 0.000000e+00 : f32
    %16 = vector.broadcast %cst_10 : f32 to vector<8x32xf32>
    %17 = arith.maximumf %15, %16 : vector<8x32xf32>
    %cst_11 = arith.constant dense<0.000000e+00> : vector<8xf32>
    %18 = vector.multi_reduction <add>, %17, %cst_11 [1] : vector<8x32xf32> to vector<8xf32>
    %19 = vector.shape_cast %18 : vector<8xf32> to vector<8x1xf32>
    %cst_12 = arith.constant 3.200000e+01 : f32
    %20 = vector.broadcast %cst_12 : f32 to vector<8x1xf32>
    %21 = arith.divf %19, %20 : vector<8x1xf32>
    %22 = vector.broadcast %21 : vector<8x1xf32> to vector<8x32xf32>
    %23 = arith.subf %17, %22 : vector<8x32xf32>
    %24 = arith.mulf %23, %23 : vector<8x32xf32>
    %cst_13 = arith.constant dense<0.000000e+00> : vector<8xf32>
    %25 = vector.multi_reduction <add>, %24, %cst_13 [1] : vector<8x32xf32> to vector<8xf32>
    %26 = vector.shape_cast %25 : vector<8xf32> to vector<8x1xf32>
    %cst_14 = arith.constant 3.200000e+01 : f32
    %27 = vector.broadcast %cst_14 : f32 to vector<8x1xf32>
    %28 = arith.divf %26, %27 : vector<8x1xf32>
    %29 = vector.broadcast %21 : vector<8x1xf32> to vector<8x32xf32>
    %30 = arith.subf %17, %29 : vector<8x32xf32>
    %cst_15 = arith.constant 9.99999974E-6 : f32
    %31 = vector.broadcast %cst_15 : f32 to vector<8x1xf32>
    %32 = arith.addf %28, %31 : vector<8x1xf32>
    %33 = math.rsqrt %32 : vector<8x1xf32>
    %34 = vector.broadcast %33 : vector<8x1xf32> to vector<8x32xf32>
    %35 = arith.mulf %30, %34 : vector<8x32xf32>
    %36 = vector.broadcast %3 : vector<1x32xf32> to vector<8x32xf32>
    %37 = arith.mulf %35, %36 : vector<8x32xf32>
    %38 = vector.broadcast %4 : vector<1x32xf32> to vector<8x32xf32>
    %39 = arith.addf %37, %38 : vector<8x32xf32>
    %40 = vector.shape_cast %39 : vector<8x32xf32> to vector<1x8x32xf32>
    %c3 = arith.constant 3 : index
    %c0_16 = arith.constant 0 : index
    %41 = vector.load %arg7[%c3, %c0_16] : memref<10x32xf32, #tpu.memory_space<vmem>>, vector<1x32xf32>
    %c4 = arith.constant 4 : index
    %c0_17 = arith.constant 0 : index
    %42 = vector.load %arg7[%c4, %c0_17] : memref<10x32xf32, #tpu.memory_space<vmem>>, vector<1x32xf32>
    %c5 = arith.constant 5 : index
    %c0_18 = arith.constant 0 : index
    %43 = vector.load %arg7[%c5, %c0_18] : memref<10x32xf32, #tpu.memory_space<vmem>>, vector<1x32xf32>
    %cst_19 = arith.constant 0.000000e+00 : f32
    %44 = vector.broadcast %cst_19 : f32 to vector<1x1x32xf32>
    %45 = tpu.concatenate %44, %40, %44 in 1 : vector<1x1x32xf32>, vector<1x8x32xf32>, vector<1x1x32xf32> -> vector<1x10x32xf32>
    %46 = vector.extract_strided_slice %45 {offsets = [0, 0, 0], sizes = [1, 8, 32], strides = [1, 1, 1]} : vector<1x10x32xf32> to vector<1x8x32xf32>
    %47 = vector.extract_strided_slice %45 {offsets = [0, 1, 0], sizes = [1, 8, 32], strides = [1, 1, 1]} : vector<1x10x32xf32> to vector<1x8x32xf32>
    %48 = vector.extract_strided_slice %45 {offsets = [0, 2, 0], sizes = [1, 8, 32], strides = [1, 1, 1]} : vector<1x10x32xf32> to vector<1x8x32xf32>
    %49 = tpu.concatenate %46, %47, %48 in 2 : vector<1x8x32xf32>, vector<1x8x32xf32>, vector<1x8x32xf32> -> vector<1x8x96xf32>
    %50 = vector.shape_cast %49 : vector<1x8x96xf32> to vector<8x96xf32>
    %c0_20 = arith.constant 0 : index
    %c0_21 = arith.constant 0 : index
    %51 = vector.load %arg5[%c0_20, %c0_21] : memref<96x32xf32, #tpu.memory_space<vmem>>, vector<96x32xf32>
    %cst_22 = arith.constant dense<0.000000e+00> : vector<8x32xf32>
    %52 = tpu.matmul %50, %51, %cst_22 {dimension_numbers = #tpu.dot_dimension_numbers<[1], [0], [0], [1], [0, 0, 1, 1], [], []>} : vector<8x96xf32>, vector<96x32xf32>, vector<8x32xf32> -> vector<8x32xf32>
    %53 = vector.broadcast %41 : vector<1x32xf32> to vector<8x32xf32>
    %54 = arith.addf %52, %53 : vector<8x32xf32>
    %cst_23 = arith.constant 0.000000e+00 : f32
    %55 = vector.broadcast %cst_23 : f32 to vector<8x32xf32>
    %56 = arith.maximumf %54, %55 : vector<8x32xf32>
    %cst_24 = arith.constant dense<0.000000e+00> : vector<8xf32>
    %57 = vector.multi_reduction <add>, %56, %cst_24 [1] : vector<8x32xf32> to vector<8xf32>
    %58 = vector.shape_cast %57 : vector<8xf32> to vector<8x1xf32>
    %cst_25 = arith.constant 3.200000e+01 : f32
    %59 = vector.broadcast %cst_25 : f32 to vector<8x1xf32>
    %60 = arith.divf %58, %59 : vector<8x1xf32>
    %61 = vector.broadcast %60 : vector<8x1xf32> to vector<8x32xf32>
    %62 = arith.subf %56, %61 : vector<8x32xf32>
    %63 = arith.mulf %62, %62 : vector<8x32xf32>
    %cst_26 = arith.constant dense<0.000000e+00> : vector<8xf32>
    %64 = vector.multi_reduction <add>, %63, %cst_26 [1] : vector<8x32xf32> to vector<8xf32>
    %65 = vector.shape_cast %64 : vector<8xf32> to vector<8x1xf32>
    %cst_27 = arith.constant 3.200000e+01 : f32
    %66 = vector.broadcast %cst_27 : f32 to vector<8x1xf32>
    %67 = arith.divf %65, %66 : vector<8x1xf32>
    %68 = vector.broadcast %60 : vector<8x1xf32> to vector<8x32xf32>
    %69 = arith.subf %56, %68 : vector<8x32xf32>
    %cst_28 = arith.constant 9.99999974E-6 : f32
    %70 = vector.broadcast %cst_28 : f32 to vector<8x1xf32>
    %71 = arith.addf %67, %70 : vector<8x1xf32>
    %72 = math.rsqrt %71 : vector<8x1xf32>
    %73 = vector.broadcast %72 : vector<8x1xf32> to vector<8x32xf32>
    %74 = arith.mulf %69, %73 : vector<8x32xf32>
    %75 = vector.broadcast %42 : vector<1x32xf32> to vector<8x32xf32>
    %76 = arith.mulf %74, %75 : vector<8x32xf32>
    %77 = vector.broadcast %43 : vector<1x32xf32> to vector<8x32xf32>
    %78 = arith.addf %76, %77 : vector<8x32xf32>
    %79 = vector.shape_cast %78 : vector<8x32xf32> to vector<1x8x32xf32>
    %80 = vector.shape_cast %79 : vector<1x8x32xf32> to vector<8x32xf32>
    %c6 = arith.constant 6 : index
    %c0_29 = arith.constant 0 : index
    %81 = vector.load %arg7[%c6, %c0_29] : memref<10x32xf32, #tpu.memory_space<vmem>>, vector<1x32xf32>
    %82 = vector.broadcast %81 : vector<1x32xf32> to vector<8x32xf32>
    %83 = arith.mulf %80, %82 : vector<8x32xf32>
    %cst_30 = arith.constant dense<0.000000e+00> : vector<8xf32>
    %84 = vector.multi_reduction <add>, %83, %cst_30 [1] : vector<8x32xf32> to vector<8xf32>
    %85 = vector.shape_cast %84 : vector<8xf32> to vector<8x1xf32>
    %c8 = arith.constant 8 : index
    %c0_31 = arith.constant 0 : index
    %86 = vector.load %arg7[%c8, %c0_31] : memref<10x32xf32, #tpu.memory_space<vmem>>, vector<1x1xf32>
    %87 = vector.broadcast %86 : vector<1x1xf32> to vector<8x1xf32>
    %88 = arith.addf %85, %87 : vector<8x1xf32>
    %c0_32 = arith.constant 0 : index
    %c0_33 = arith.constant 0 : index
    %c0_34 = arith.constant 0 : index
    %89 = vector.load %arg2[%c0_32, %c0_33, %c0_34] : memref<1x8x1xf32, #tpu.memory_space<vmem>>, vector<1x8x1xf32>
    %90 = vector.shape_cast %89 : vector<1x8x1xf32> to vector<8x1xf32>
    %cst_35 = arith.constant 5.000000e-01 : f32
    %91 = vector.broadcast %cst_35 : f32 to vector<8x1xf32>
    %92 = arith.cmpf ogt, %90, %91 : vector<8x1xf32>
    %cst_36 = arith.constant 0.000000e+00 : f32
    %93 = vector.broadcast %cst_36 : f32 to vector<8x1xf32>
    %94 = arith.select %92, %93, %88 : vector<8x1xi1>, vector<8x1xf32>
    %c0_37 = arith.constant 0 : index
    %c0_38 = arith.constant 0 : index
    %c0_39 = arith.constant 0 : index
    %95 = vector.load %arg3[%c0_37, %c0_38, %c0_39] : memref<1x8x1xf32, #tpu.memory_space<vmem>>, vector<1x8x1xf32>
    %96 = vector.shape_cast %95 : vector<1x8x1xf32> to vector<8x1xf32>
    %c7 = arith.constant 7 : index
    %c0_40 = arith.constant 0 : index
    %97 = vector.load %arg7[%c7, %c0_40] : memref<10x32xf32, #tpu.memory_space<vmem>>, vector<1x32xf32>
    %98 = vector.broadcast %96 : vector<8x1xf32> to vector<8x32xf32>
    %99 = vector.broadcast %97 : vector<1x32xf32> to vector<8x32xf32>
    %100 = arith.cmpf ogt, %98, %99 : vector<8x32xf32>
    %101 = arith.extui %100 : vector<8x32xi1> to vector<8x32xi32>
    %cst_41 = arith.constant dense<0> : vector<8xi32>
    %102 = vector.multi_reduction <add>, %101, %cst_41 [1] : vector<8x32xi32> to vector<8xi32>
    %103 = vector.shape_cast %102 : vector<8xi32> to vector<8x1xi32>
    %104 = tpu.iota {dimensions = array<i32: 1>} : vector<8x16xi32>
    %105 = vector.broadcast %103 : vector<8x1xi32> to vector<8x16xi32>
    %106 = arith.cmpi eq, %105, %104 : vector<8x16xi32>
    %107 = arith.extui %106 : vector<8x16xi1> to vector<8x16xi32>
    %108 = arith.sitofp %107 : vector<8x16xi32> to vector<8x16xf32>
    %c0_42 = arith.constant 0 : index
    %c0_43 = arith.constant 0 : index
    %109 = vector.load %arg6[%c0_42, %c0_43] : memref<16x32xf32, #tpu.memory_space<vmem>>, vector<16x32xf32>
    %cst_44 = arith.constant dense<0.000000e+00> : vector<8x32xf32>
    %110 = tpu.matmul %108, %109, %cst_44 {dimension_numbers = #tpu.dot_dimension_numbers<[1], [0], [0], [1], [0, 0, 1, 1], [], []>} : vector<8x16xf32>, vector<16x32xf32>, vector<8x32xf32> -> vector<8x32xf32>
    %111 = vector.shape_cast %94 : vector<8x1xf32> to vector<1x8xf32>
    %c0_45 = arith.constant 0 : index
    %c0_46 = arith.constant 0 : index
    %c0_47 = arith.constant 0 : index
    %112 = vector.load %arg8[%c0_45, %c0_46, %c0_47] : memref<1x1x8xf32, #tpu.memory_space<vmem>>, vector<1x1x8xf32>
    %113 = vector.shape_cast %112 : vector<1x1x8xf32> to vector<1x8xf32>
    %114 = vector.shape_cast %111 : vector<1x8xf32> to vector<1x1x8xf32>
    tpu.vector_store %arg8[%c0_45, %c0_46, %c0_47], %114 {strides = array<i32>} : memref<1x1x8xf32, #tpu.memory_space<vmem>>, vector<1x1x8xf32>,
    %115 = vector.shape_cast %110 : vector<8x32xf32> to vector<1x8x32xf32>
    %c0_48 = arith.constant 0 : index
    %c0_49 = arith.constant 0 : index
    %c0_50 = arith.constant 0 : index
    %c0_51 = arith.constant 0 : index
    %116 = vector.load %arg9[%c0_48, %c0_49, %c0_50, %c0_51] : memref<1x1x8x32xf32, #tpu.memory_space<vmem>>, vector<1x1x8x32xf32>
    %117 = vector.shape_cast %116 : vector<1x1x8x32xf32> to vector<1x8x32xf32>
    %118 = vector.shape_cast %115 : vector<1x8x32xf32> to vector<1x1x8x32xf32>
    tpu.vector_store %arg9[%c0_48, %c0_49, %c0_50, %c0_51], %118 {strides = array<i32>} : memref<1x1x8x32xf32, #tpu.memory_space<vmem>>, vector<1x1x8x32xf32>,
    return
  }
  func.func @transform_0(%arg0: i32) -> (i32, i32, i32, i32) {
    %c0_i32 = arith.constant 0 : i32
    %c0_i32_0 = arith.constant 0 : i32
    %c0_i32_1 = arith.constant 0 : i32
    %c0_i32_2 = arith.constant 0 : i32
    return %arg0, %c0_i32, %c0_i32_0, %c0_i32_1 : i32, i32, i32, i32
  }
  func.func @transform_1(%arg0: i32) -> (i32, i32, i32) {
    %c0_i32 = arith.constant 0 : i32
    %c0_i32_0 = arith.constant 0 : i32
    %c0_i32_1 = arith.constant 0 : i32
    return %arg0, %c0_i32, %c0_i32_0 : i32, i32, i32
  }
  func.func @transform_2(%arg0: i32) -> (i32, i32, i32) {
    %c0_i32 = arith.constant 0 : i32
    %c0_i32_0 = arith.constant 0 : i32
    %c0_i32_1 = arith.constant 0 : i32
    return %arg0, %c0_i32, %c0_i32_0 : i32, i32, i32
  }
  func.func @transform_3(%arg0: i32) -> (i32, i32) {
    %c0_i32 = arith.constant 0 : i32
    %c0_i32_0 = arith.constant 0 : i32
    %c0_i32_1 = arith.constant 0 : i32
    return %c0_i32, %c0_i32_0 : i32, i32
  }
  func.func @transform_4(%arg0: i32) -> (i32, i32) {
    %c0_i32 = arith.constant 0 : i32
    %c0_i32_0 = arith.constant 0 : i32
    %c0_i32_1 = arith.constant 0 : i32
    return %c0_i32, %c0_i32_0 : i32, i32
  }
  func.func @transform_5(%arg0: i32) -> (i32, i32) {
    %c0_i32 = arith.constant 0 : i32
    %c0_i32_0 = arith.constant 0 : i32
    %c0_i32_1 = arith.constant 0 : i32
    return %c0_i32, %c0_i32_0 : i32, i32
  }
  func.func @transform_6(%arg0: i32) -> (i32, i32) {
    %c0_i32 = arith.constant 0 : i32
    %c0_i32_0 = arith.constant 0 : i32
    %c0_i32_1 = arith.constant 0 : i32
    return %c0_i32, %c0_i32_0 : i32, i32
  }
  func.func @transform_7(%arg0: i32) -> (i32, i32, i32) {
    %c0_i32 = arith.constant 0 : i32
    %c0_i32_0 = arith.constant 0 : i32
    %c0_i32_1 = arith.constant 0 : i32
    return %arg0, %c0_i32, %c0_i32_0 : i32, i32, i32
  }
  func.func @transform_8(%arg0: i32) -> (i32, i32, i32, i32) {
    %c0_i32 = arith.constant 0 : i32
    %c0_i32_0 = arith.constant 0 : i32
    %c0_i32_1 = arith.constant 0 : i32
    %c0_i32_2 = arith.constant 0 : i32
    return %arg0, %c0_i32, %c0_i32_0, %c0_i32_1 : i32, i32, i32, i32
  }
}

</mosaic_0001>

<bundles_post_ra>
// kernel: tpu_custom_call.1
= control target key start
LH: loop header
LB: loop body
LE: loop exit
PB: predicated region body
PF: predicated region fallthrough
CT: control target
= control target key end

     0   :  { %14 = vsyncpa [#allocation3], 0  ;;  %s1562_s0 = inlined_call_operand.vmem [shape: f32[2,1,8,32], index: 0, kind: input, shape index: {}]   ;;  %s1563_s1 = inlined_call_operand.vmem [shape: f32[2,8,1], index: 1, kind: input, shape index: {}]   ;;  %s1564_s2 = inlined_call_operand.vmem [shape: f32[2,8,1], index: 2, kind: input, shape index: {}]   ;;  %s1565_s3 = inlined_call_operand.vmem [shape: f32[96,32], index: 3, kind: input, shape index: {}]   ;;  %s1566_s4 = inlined_call_operand.vmem [shape: f32[96,32], index: 4, kind: input, shape index: {}]   ;;  %s1567_s5 = inlined_call_operand.vmem [shape: f32[16,32], index: 5, kind: input, shape index: {}]   ;;  %s1568_s6 = inlined_call_operand.vmem [shape: f32[10,32], index: 6, kind: input, shape index: {}]   ;;  %s1569_s7 = inlined_call_operand.hbm [shape: f32[2,1,8], index: 7, kind: output, shape index: {0}]   ;;  %s1570_s8 = inlined_call_operand.hbm [shape: f32[2,1,8,32], index: 8, kind: output, shape index: {1}]  }
   0x1   :  { %16 = vsyncpa [#allocation3 + $0x1], 0 }
   0x2   :  { %17 = vsyncpa [#allocation5], 0 }
   0x3   :  { %19 = vsyncpa [#allocation5 + $0x1], 0  ;;  %s1266_s27 = smov 0   ;;  %s1268_s28 = smov 0  }
   0x4   :  { %s1270_s29 = smov 0   ;;  %s1272_s30 = smov 0  }
   0x5 LB: > { %s1287_s9 = sadd.s32 4294967295, %s1211_s30   ;;  %s906_s10 = sadd.s32 4294967294, %s1211_s30   ;;  %s1211_s30 = sphi %s1272_s30, %s1576_s30   ;;  %s1207_s29 = sphi %s1270_s29, %s1575_s29   ;;  %s1203_s28 = sphi %s1268_s28, %s1574_s28   ;;  %s1199_s27 = sphi %s1266_s27, %s1573_s27  }
   0x6   : > { %s1291_s11 = sadd.s32 1, %s1211_s30   ;;  %s194_s12 = sadd.s32 1, %s1207_s29 }
   0x7   : > { %s191_s13 = ssub.s32 %s1211_s30, %s1291_s11  ;;  %p204_p0 = scmp.ne.s32.totalorder %s1207_s29, %s1203_s28 }
   0x8   : > { %p192_p1 = scmp.eq.s32.totalorder %s191_s13, 0  ;;  %p205_p2 = scmp.eq.s32.totalorder %s1287_s9, 1 }
   0x9   : > { %p210_p3 = scmp.ne.s32.totalorder %s1203_s28, %s1199_s27  ;;  %p211_p4 = scmp.eq.s32.totalorder %s906_s10, 1 }
   0xa   : > { %s1302_s14 = scalar_select %p192_p1, %s1207_s29, %s194_s12  }
   0xb   : > { %p1304_p5 = por %p205_p2, %p204_p0  ;;  %p1308_p6 = por %p211_p4, %p210_p3 }
   0xc   : > { %p909_p7 = scmp.ge.s32.totalorder %s1211_s30, 1  ;;  %p288_p8 = scmp.lt.s32.totalorder %s1211_s30, 3 }
   0xe   : > { %p289_p9 = pnand %p909_p7, %p288_p8 }
   0xf   : > { %p333_p10 = scmp.lt.s32.totalorder (!%p289_p9), %s1287_s9, 1  ;;  %v1213_v0 = vmov (!%p289_p9), 0.0|0.0   ;;  %v375_v1 = vld [vmem:[%s1565_s3] sm:$0xff] (!%p289_p9)  ;;  %v376_v2 = vld [vmem:[%s1565_s3 + $0x8] sm:$0xff] (!%p289_p9)  ;;  %v377_v3 = vld [vmem:[%s1565_s3 + $0x10] sm:$0xff] (!%p289_p9)  ;;  %vm1214_vm0 = vmmov (!%p289_p9), 0  }
  0x10   : > { %292 = sbr.rel (%p289_p9) target bundleno = 1627 (0x65b), region = 48  ;;  %1022 = vmatprep.subr.bf16.mxu0 (!%p289_p9), %v1213_v0  ;;  %1040 = vmatprep.subr.bf16.mxu1 (!%p289_p9), %v1213_v0  ;;  %v1023_v4 = vpack.c.bf16 (!%p289_p9), %v376_v2, %v375_v1  ;;  %v378_v5 = vld [vmem:[%s1565_s3 + $0x18] sm:$0xff] (!%p289_p9)  ;;  %v1215_v7 = vmov (!%p289_p9), 0.0   ;;  %v379_v8 = vld [vmem:[%s1565_s3 + $0x20] sm:$0xff] (!%p289_p9)  ;;  %v380_v9 = vld [vmem:[%s1565_s3 + $0x28] sm:$0xff] (!%p289_p9)  ;;  %vm352_vm1 = vcmask (!%p289_p9), 1040384  }
  0x11   : > { %v1026_v6 = vpack.c.bf16 (!%p289_p9), %v378_v5, %v377_v3  ;;  %985 = vmatprep.mubr.msk.f32.mxu0 (!%p289_p9), %vm1214_vm0, %v1215_v7  ;;  %1012 = vmatprep.mubr.msk.f32.mxu1 (!%p289_p9), %vm1214_vm0, %v1215_v7  ;;  %v1029_v12 = vpack.c.bf16 (!%p289_p9), %v380_v9, %v379_v8  ;;  %vm357_vm2 = vcmask (!%p289_p9), 1046528   ;;  %v381_v15 = vld [vmem:[%s1565_s3 + $0x30] sm:$0xff] (!%p289_p9)  ;;  %v382_v16 = vld [vmem:[%s1565_s3 + $0x38] sm:$0xff] (!%p289_p9)  ;;  %vm364_vm3 = vcmask (!%p289_p9), 1045504   ;;  %s1216_s25 = smov (!%p289_p9), 32   ;;  %v383_v23 = vld [vmem:[%s1565_s3 + $0x40] sm:$0xff] (!%p289_p9) }
  0x12   : > { %1024 = vmatpush3.bf16.msra.mxu0 (!%p289_p9), %v1023_v4  ;;  %v1032_v22 = vpack.c.bf16 (!%p289_p9), %v382_v16, %v381_v15  ;;  %v384_v24 = vld [vmem:[%s1565_s3 + $0x48] sm:$0xff] (!%p289_p9)  ;;  %s1217_s18 = smov (!%p289_p9), 64   ;;  %v385_v27 = vld [vmem:[%s1565_s3 + $0x50] sm:$0xff] (!%p289_p9)  ;;  %v386_v28 = vld [vmem:[%s1565_s3 + $0x58] sm:$0xff] (!%p289_p9)  ;;  %vm371_vm4 = vcmask (!%p289_p9), 261120   ;;  %vm373_vm5 = vcmask (!%p289_p9), 523264  }
  0x13   : > { %1025 = vmatprep.subr.bf16.mxu0 (!%p289_p9), %v1213_v0  ;;  %v1035_v26 = vpack.c.bf16 (!%p289_p9), %v384_v24, %v383_v23  ;;  %v1038_v29 = vpack.c.bf16 (!%p289_p9), %v386_v28, %v385_v27  ;;  %vm391_vm6 = vcmask (!%p289_p9), 785408   ;;  %v914_v34 = vld [vmem:[%s1568_s6] ss:$0 sm:$0xff] (!%p289_p9)  ;;  %v515_v46 = vld [vmem:[%s1566_s4 + $0x8] sm:$0xff] (!%p289_p9)  ;;  %v516_v47 = vld [vmem:[%s1566_s4 + $0x10] sm:$0xff] (!%p289_p9)  ;;  %v1218_v9 = vmov (!%p289_p9), 0  }
  0x14   : > { %v514_v45 = vld [vmem:[%s1566_s4] sm:$0xff] (!%p289_p9)  ;;  %v517_v49 = vld [vmem:[%s1566_s4 + $0x18] sm:$0xff] (!%p289_p9)  ;;  %v519_v52 = vld [vmem:[%s1566_s4 + $0x28] sm:$0xff] (!%p289_p9)  ;;  %1111 = vset.pattern.permute.xlu0 (!%p289_p9), %v1218_v9  ;;  %1112 = vset.pattern.permute.xlu1 (!%p289_p9), %v1218_v9  ;;  %vm678_vm8 = vcmask (!%p289_p9), 130048   ;;  %s929_s24 = sshll.u32 (!%p289_p9), %s1287_s9, 7  ;;  %s1219_s20 = smov (!%p289_p9), [#allocation4]  }
  0x15   : > { %v1041_v48 = vpack.c.bf16 (!%p289_p9), %v515_v46, %v514_v45  ;;  %v1044_v50 = vpack.c.bf16 (!%p289_p9), %v517_v49, %v516_v47  ;;  %v518_v51 = vld [vmem:[%s1566_s4 + $0x20] sm:$0xff] (!%p289_p9)  ;;  %v520_v54 = vld [vmem:[%s1566_s4 + $0x30] sm:$0xff] (!%p289_p9)  ;;  %v521_v55 = vld [vmem:[%s1566_s4 + $0x38] sm:$0xff] (!%p289_p9)  ;;  %v671_v45 = vlaneseq (!%p289_p9) }
  0x16   : > { %1027 = vmatpush3.bf16.msra.mxu0 (!%p289_p9), %v1026_v6  ;;  %v1047_v53 = vpack.c.bf16 (!%p289_p9), %v519_v52, %v518_v51  ;;  %v1050_v56 = vpack.c.bf16 (!%p289_p9), %v521_v55, %v520_v54  ;;  %v522_v57 = vld [vmem:[%s1566_s4 + $0x40] sm:$0xff] (!%p289_p9)  ;;  %v523_v58 = vld [vmem:[%s1566_s4 + $0x48] sm:$0xff] (!%p289_p9)  ;;  %v524_v60 = vld [vmem:[%s1566_s4 + $0x50] sm:$0xff] (!%p289_p9) }
  0x17   : > { %s334_s23 = scalar_select %p333_p10, %s1287_s9, 1  ;;  %1028 = vmatprep.subr.bf16.mxu0 %v1213_v0  ;;  %1042 = vmatpush3.bf16.msra.mxu1 %v1041_v48  ;;  %v1053_v59 = vpack.c.bf16 %v523_v58, %v522_v57  ;;  %v525_v61 = vld [vmem:[%s1566_s4 + $0x58] sm:$0xff]  ;;  %v916_v4 = vld [vmem:[%s1568_s6 + $0x1] ss:$0 sm:$0xff]  ;;  %v917_v6 = vld [vmem:[%s1568_s6 + $0x2] ss:$0 sm:$0xff] }
  0x18   : > { %1043 = vmatprep.subr.bf16.mxu1 %v1213_v0  ;;  %v1056_v62 = vpack.c.bf16 %v525_v61, %v524_v60  ;;  %v924_v24 = vld [vmem:[%s1568_s6 + $0x7] ss:$0 sm:$0xff]  ;;  %v921_v61 = vld [vmem:[%s1568_s6 + $0x5] ss:$0 sm:$0xff] }
  0x19   : > { %s1330_s26 = sshll.u32 %s334_s23, 3 }
  0x1a   : > { %s336_s13 = scalar_lea.vmem %s1562_s0, %s1330_s26  ;;  %1030 = vmatpush3.bf16.msra.mxu0 %v1029_v12  ;;  %s344_s10 = scalar_lea.vmem %s1564_s2, %s1330_s26 }
  0x1b   : > { %v345_v10 = vld [vmem:[%s336_s13] sm:$0xff]  ;;  %1031 = vmatprep.subr.bf16.mxu0 %v1213_v0  ;;  %1045 = vmatpush3.bf16.msra.mxu1 %v1044_v50  ;;  %v1461_v50 = vand.u32 127, %v671_v45  ;;  %s340_s21 = scalar_lea.vmem %s1563_s1, %s1330_s26 }
  0x1c   : > { %v350_v11 = vrot.slane %v345_v10, 7  ;;  %1046 = vmatprep.subr.bf16.mxu1 %v1213_v0 }
  0x1e   : > { %v353_v13 = vsel %vm352_vm1, 0.0, %v350_v11  ;;  %v354_v14 = vsel %vm352_vm1, %v350_v11, 0.0  ;;  %1033 = vmatpush3.bf16.msra.mxu0 %v1032_v22 }
  0x1f   : > { %v358_v17 = vrot.slane %v353_v13, 1  ;;  %v359_v18 = vrot.slane %v354_v14, 1  ;;  %v365_v19 = vrot.slane %v353_v13, 2  ;;  %v366_v20 = vrot.slane %v354_v14, 2  ;;  %1034 = vmatprep.subr.bf16.mxu0 %v1213_v0  ;;  %1048 = vmatpush3.bf16.msra.mxu1 %v1047_v53 }
  0x20   : > { %1049 = vmatprep.subr.bf16.mxu1 %v1213_v0 }
  0x21   : > { %v360_v21 = vsel %vm357_vm2, %v358_v17, %v359_v18  ;;  %v367_v25 = vsel %vm364_vm3, %v365_v19, %v366_v20  ;;  %v645_v19 = vld [vmem:[%s344_s10] sm:$0xff] }
  0x22   : > { %361 = vrot.lane.b32.xlu0 %v360_v21, %s1216_s25  ;;  %1036 = vmatpush3.bf16.msra.mxu0 %v1035_v26 }
  0x23   : > { %1037 = vmatprep.subr.bf16.mxu0 %v1213_v0  ;;  %1051 = vmatpush3.bf16.msra.mxu1 %v1050_v56 }
  0x24   : > { %1052 = vmatprep.subr.bf16.mxu1 %v1213_v0 }
  0x26   : > { %368 = vrot.lane.b32.xlu0 %v367_v25, %s1217_s18  ;;  %1039 = vmatpush3.bf16.msra.mxu0 %v1038_v29 }
  0x27   : > { %1058 = vmatprep.subr.bf16.mxu0 %v1213_v0  ;;  %1054 = vmatpush3.bf16.msra.mxu1 %v1053_v59  ;;  %v920_v59 = vld [vmem:[%s1568_s6 + $0x4] ss:$0 sm:$0xff] }
  0x28   : > { %1055 = vmatprep.subr.bf16.mxu1 %v1213_v0 }
  0x2b   : > { %1057 = vmatpush3.bf16.msra.mxu1 %v1056_v62 }
  0x94   : > { %v362_v30 = vpop.permute.xlu0 %361 }
  0x95   : > { %v372_v31 = vsel %vm371_vm4, %v353_v13, %v362_v30  ;;  %v918_v30 = vld [vmem:[%s1568_s6 + $0x3] ss:$0 sm:$0xff] }
  0x98   : > { %v369_v32 = vpop.permute.xlu0 %368 }
  0x99   : > { %v374_v33 = vsel %vm373_vm5, %v372_v31, %v369_v32 }
  0x9a   : > { %986 = vmatmul.mubr.msk.f32.vlgmr.msra.gmra.mrb[0].mxu0 %vm391_vm6, %v374_v33 }
  0x9b   : > { %1019 = vmatprep.mubr.msk.f32.mxu0 %vm1214_vm0, %v1215_v7 }
 0x16d   : > { %v461_v35 = vpop.f32.mrb[0].mxu0 }
 0x16e   : > { %v462_v36 = vadd.f32 %v914_v34, %v461_v35  ;;  %v987_v37 = vpop.f32.mrb[1].mxu0 }
 0x170   : > { %v465_v38 = vmax.f32 %v462_v36, 0.0 }
 0x172   : > { %v466_v39 = vsel %vm371_vm4, %v465_v38, 0.0 }
 0x173   : > { %467 = vadd.xlane.f32.xlu1 %v466_v39  ;;  %v677_v39 = vld [vmem:[%s1567_s5 + $0x8] sm:$0xff] }
 0x200   : > { %v468_v40 = vpop.xlane.xlu1 %467 }
 0x201   : > { %v470_v41 = vmul.f32 0.03125, %v468_v40 }
 0x203   : > { %v471_v42 = vsub.f32 %v465_v38, %v470_v41  ;;  %v676_v38 = vld [vmem:[%s1567_s5] sm:$0xff] }
 0x204   : > { %v1059_v40 = vpack.c.bf16 %v677_v39, %v676_v38 }
 0x205   : > { %v472_v43 = vmul.f32 %v471_v42, %v471_v42 }
 0x206   : > { %1060 = vmatpush3.bf16.msra.mxu0 %v1059_v40 }
 0x207   : > { %v473_v44 = vsel %vm371_vm4, %v472_v43, 0.0 }
 0x208   : > { %474 = vadd.xlane.f32.xlu1 %v473_v44 }
 0x295   : > { %v475_v63 = vpop.xlane.xlu1 %474 }
 0x296   : > { %v476_v1 = vmul.f32 0.03125, %v475_v63 }
 0x298   : > { %v477_v2 = vadd.f32 1e-05, %v476_v1 }
 0x29a   : > { %1113 = vrsqrt.f32 %v477_v2 }
 0x2a4   : > { %v1114_v3 = vpop.eup %1113 }
 0x2a5   : > { %v479_v5 = vmul.f32 %v1114_v3, %v471_v42 }
 0x2a7   : > { %v484_v8 = vmul.f32 %v916_v4, %v479_v5  ;;  %v642_v5 = vld [vmem:[%s340_s21] sm:$0xff]  ;;  %s1121_s21 = sshll.u32 %s1219_s20, 4  ;;  %s1122_s21 = int_to_ptr.vmem [resolvable:$false] %s1121_s21 }
 0x2a8   : > { %vm643_vm10 = vcmp.gt.f32.partialorder %v642_v5, 0.5  ;;  %s1123_s22 = scalar_lea.vmem %s1122_s21, 256 }
 0x2a9   : > { %v489_v0 = vadd.f32 %v917_v6, %v484_v8  ;;  %v923_v6 = vld [vmem:[%s1568_s6 + $0x8] ss:$0 sm:$0xff] }
 0x2ab   : > { %v494_v10 = vrot.slane %v489_v0, 7 }
 0x2ad   : > { %v496_v11 = vsel %vm352_vm1, 0.0, %v494_v10  ;;  %v497_v12 = vsel %vm352_vm1, %v494_v10, 0.0 }
 0x2ae   : > { %v506_v13 = vrot.slane %v496_v11, 2  ;;  %v507_v14 = vrot.slane %v497_v12, 2  ;;  %v500_v15 = vrot.slane %v496_v11, 1  ;;  %v501_v16 = vrot.slane %v497_v12, 1 }
 0x2b0   : > { %v508_v17 = vsel %vm364_vm3, %v506_v13, %v507_v14  ;;  %v502_v18 = vsel %vm357_vm2, %v500_v15, %v501_v16 }
 0x2b1   : > { %509 = vrot.lane.b32.xlu1 %v508_v17, %s1217_s18  ;;  %503 = vrot.lane.b32.xlu0 %v502_v18, %s1216_s25  ;;  %s1477_s25 = sand.u32 1, %s1203_s28  }
 0x2b2   : > { %s910_s18 = sshll.u32 %s1477_s25, 3  ;;  %s769_s19 = scalar_lea.sflag [#allocation5], %s1477_s25 }
 0x2b3   : > { %s332_s17 = scalar_lea.vmem [#allocation4], %s910_s18  ;;  %s1492_s18 = scalar_lea.hbm %s1570_s8, %s929_s24 }
 0x2b4   : > { %s795_s10 = sshll.u32 %s332_s17, 4  ;;  %s796_s10 = int_to_ptr.vmem [resolvable:$true] %s795_s10 }
 0x2b5   : > { %649 = vperm.xlu0 %1111, %v645_v19   ;;  %s1117_s26 = scalar_lea.vmem %s796_s10, 128  ;;  %p1124_p0 = scmp.lt.s32.totalorder %s796_s10, %s1122_s21 }
 0x2b6   : > { %p1118_p11 = scmp.ne.s32.totalorder %s796_s10, %s1117_s26  ;;  %p1125_p1 = scmp.lt.s32.totalorder %s1123_s22, %s1117_s26 }
 0x2b8   : > { %p1119_p12 = pnand %p1118_p11, %p1304_p5  ;;  %p1126_p2 = por %p1125_p1, %p1124_p0 }
 0x2ba   : > { %p1120_p13 = pneg %p1119_p12 }
 0x2bc   : > { %p1127_p3 = pnand %p1126_p2, %p1120_p13 }
 0x323   : > { %v510_v20 = vpop.permute.xlu1 %509  ;;  %v504_v21 = vpop.permute.xlu0 %503 }
 0x324   : > { %v512_v22 = vsel %vm371_vm4, %v496_v11, %v504_v21 }
 0x325   : > { %v513_v23 = vsel %vm373_vm5, %v512_v22, %v510_v20 }
 0x326   : > { %1013 = vmatmul.mubr.msk.f32.vlgmr.msra.gmra.mrb[0].mxu1 %vm391_vm6, %v513_v23 }
 0x334   : > { %v650_v25 = vpop.permute.xlu0 %649 }
 0x335   : > { %vm656_vm7 = vcmp.gt.f32.partialorder %v650_v25, %v924_v24 }
 0x336   : > { %v657_v26 = vsel %vm656_vm7, 1, %v1218_v9 }
 0x337   : > { %v658_v27 = vsel %vm371_vm4, %v657_v26, 0 }
 0x338   : > { %v660_v28 = vshrl.u32 %v658_v27, 16  ;;  %v659_v34 = vand.u32 65535, %v658_v27 }
 0x33a   : > { %v662_v29 = vcvt.s32.f32 %v660_v28  ;;  %v661_v37 = vcvt.s32.f32 %v659_v34 }
 0x33c   : > { %665 = vadd.xlane.f32.xlu1 %v662_v29 }
 0x3c9   : > { %v666_v41 = vpop.xlane.xlu1 %665 }
 0x3ca   : > { %v668_v42 = vcvt.f32.s32 %v666_v41 }
 0x3cc   : > { %v669_v47 = vshll.u32 %v668_v42, 16 }
 0x3f9   : > { %v599_v31 = vpop.f32.mrb[0].mxu1 }
 0x3fa   : > { %v600_v32 = vadd.f32 %v918_v30, %v599_v31  ;;  %v1014_v33 = vpop.f32.mrb[1].mxu1 }
 0x3fc   : > { %v603_v35 = vmax.f32 %v600_v32, 0.0 }
 0x3fe   : > { %v604_v36 = vsel %vm371_vm4, %v603_v35, 0.0 }
 0x3ff   : > { %605 = vadd.xlane.f32.xlu0 %v604_v36 }
 0x403   : > { %663 = vadd.xlane.f32.xlu0 %v661_v37 }
 0x48c   : > { %v606_v43 = vpop.xlane.xlu0 %605 }
 0x48d   : > { %v607_v44 = vmul.f32 0.03125, %v606_v43 }
 0x48f   : > { %v608_v46 = vsub.f32 %v603_v35, %v607_v44 }
 0x490   : > { %v664_v48 = vpop.xlane.xlu0 %663 }
 0x491   : > { %v609_v49 = vmul.f32 %v608_v46, %v608_v46  ;;  %v667_v51 = vcvt.f32.s32 %v664_v48 }
 0x493   : > { %v610_v52 = vsel %vm371_vm4, %v609_v49, 0.0  ;;  %v670_v53 = vadd.s32 %v669_v47, %v667_v51 }
 0x494   : > { %611 = vadd.xlane.f32.xlu0 %v610_v52 }
 0x495   : > { %vm673_vm9 = vcmp.eq.s32.totalorder %v670_v53, %v1461_v50 }
 0x496   : > { %v925_v54 = vsel %vm673_vm9, 1.0, %v1215_v7  ;;  %v922_v7 = vld [vmem:[%s1568_s6 + $0x6] ss:$0 sm:$0xff] }
 0x497   : > { %1020 = vmatmul.mubr.msk.f32.vlgmr.msra.gmra.mrb[2].mxu0 %vm678_vm8, %v925_v54 }
 0x521   : > { %v612_v55 = vpop.xlane.xlu0 %611 }
 0x522   : > { %v613_v56 = vmul.f32 0.03125, %v612_v55 }
 0x524   : > { %v614_v57 = vadd.f32 1e-05, %v613_v56 }
 0x526   : > { %1115 = vrsqrt.f32 %v614_v57 }
 0x530   : > { %v1116_v58 = vpop.eup %1115 }
 0x531   : > { %v616_v60 = vmul.f32 %v1116_v58, %v608_v46 }
 0x533   : > { %v621_v62 = vmul.f32 %v920_v59, %v616_v60 }
 0x535   : > { %v626_v63 = vadd.f32 %v921_v61, %v621_v62 }
 0x537   : > { %v632_v1 = vmul.f32 %v922_v7, %v626_v63 }
 0x539   : > { %v633_v2 = vsel %vm371_vm4, %v632_v1, 0.0 }
 0x53a   : > { %634 = vadd.xlane.f32.xlu0 %v633_v2 }
 0x56a   : > { %v748_v3 = vpop.f32.mrb[2].mxu0 }
 0x56b   : > { %763 = vst.msk [vmem:[%s332_s17] sm:$0xff] %vm371_vm4, %v748_v3  ;;  %v1021_v4 = vpop.f32.mrb[3].mxu0 }
 0x5c7   : > { %v635_v8 = vpop.xlane.xlu0 %634 }
 0x5c8   : > { %v641_v9 = vadd.f32 %v923_v6, %v635_v8 }
 0x5ca   : > { %v644_v0 = vsel %vm643_vm10, 0.0, %v641_v9 }
 0x5cb   : > { %754 = vperm.xlu1 %1112, %v644_v0  }
 0x5cc   : > { %1130 = shalt.err (!%p1127_p3)
}
 0x5cd   : > { %s1131_s17 = scalar_lea.hbm %s1492_s18, 128  ;;  %s1135_s12 = scalar_lea.hbm %s1570_s8, 256 }
 0x5ce   : > { %p1132_p4 = scmp.ne.s32.totalorder %s1492_s18, %s1131_s17  ;;  %p1136_p9 = scmp.lt.u32.totalorder %s1492_s18, %s1570_s8 }
 0x5cf   : > { %p1137_p10 = scmp.lt.u32.totalorder %s1135_s12, %s1131_s17  ;;  %p1139_p12 = scmp.lt.u32.totalorder %s1131_s17, %s1492_s18 }
 0x5d0   : > { %p1133_p7 = pnand %p1132_p4, %p1304_p5 }
 0x5d1   : > { %p1138_p11 = por %p1137_p10, %p1136_p9 }
 0x5d2   : > { %p1134_p8 = pneg %p1133_p7 }
 0x5d3   : > { %p1140_p13 = por %p1139_p12, %p1138_p11 }
 0x5d5   : > { %p1141_p0 = pnand %p1140_p13, %p1134_p8 }
 0x5d7   : > { %1144 = shalt.err (!%p1141_p0)
}
 0x5d8   : > { %1062 = dma.vmem_to_hbm [thread:$0]  (%p1304_p5), %s796_s10, 128, %s1492_s18, %s769_s19   ;;  %v757_v10 = vshrl.u32 %v671_v45, 7  ;;  %vm761_vm11 = vcmask 57344  }
 0x5d9   : > { %s928_s26 = sshll.u32 %s1287_s9, 4  ;;  %s325_s21 = scalar_lea.vmem [#allocation2], %s1477_s25 }
 0x5da   : > { %v758_v11 = vsub.s32 %v1461_v50, %v757_v10  ;;  %s782_s22 = sshll.u32 %s325_s21, 4  ;;  %s1519_s24 = scalar_lea.hbm %s1569_s7, %s928_s26  ;;  %s1521_s22 = int_to_ptr.vmem [resolvable:$true] %s782_s22 }
 0x5db   : > { %s765_s10 = scalar_lea.sflag [#allocation3], %s1477_s25  ;;  %s1145_s18 = scalar_lea.vmem %s1521_s22, 16 }
 0x5dc   : > { %p1146_p1 = scmp.ne.s32.totalorder %s1521_s22, %s1145_s18  ;;  %s1220_s9 = smov [#allocation2]  }
 0x5dd   : > { %s1149_s19 = sshll.u32 %s1220_s9, 4  ;;  %s1150_s19 = int_to_ptr.vmem [resolvable:$false] %s1149_s19 }
 0x5de   : > { %p1147_p2 = pnand %p1146_p1, %p1304_p5  ;;  %s1151_s12 = scalar_lea.vmem %s1150_s19, 32 }
 0x5df   : > { %p1152_p4 = scmp.lt.s32.totalorder %s1521_s22, %s1150_s19  ;;  %p1153_p7 = scmp.lt.s32.totalorder %s1151_s12, %s1145_s18 }
 0x5e0   : > { %p1148_p3 = pneg %p1147_p2 }
 0x5e1   : > { %p1154_p8 = por %p1153_p7, %p1152_p4 }
 0x5e3   : > { %p1155_p9 = pnand %p1154_p8, %p1148_p3 }
 0x64a   : > { %v755_v12 = vpop.permute.xlu1 %754 }
 0x64b   : > { %v759_v13 = vrot.slane %v755_v12, %v758_v11 }
 0x64d   : > { %762 = vst.msk [vmem:[%s325_s21] sm:$0x1] %vm761_vm11, %v759_v13 }
 0x64e   : > { %1158 = shalt.err (!%p1155_p9)
}
 0x64f   : > { %s1159_s25 = scalar_lea.hbm %s1519_s24, 16  ;;  %s1163_s26 = scalar_lea.hbm %s1569_s7, 32 }
 0x650   : > { %p1160_p10 = scmp.ne.s32.totalorder %s1519_s24, %s1159_s25  ;;  %p1164_p13 = scmp.lt.u32.totalorder %s1519_s24, %s1569_s7 }
 0x651   : > { %p1165_p0 = scmp.lt.u32.totalorder %s1163_s26, %s1159_s25  ;;  %p1167_p2 = scmp.lt.u32.totalorder %s1159_s25, %s1519_s24 }
 0x652   : > { %p1161_p11 = pnand %p1160_p10, %p1304_p5 }
 0x653   : > { %p1166_p1 = por %p1165_p0, %p1164_p13 }
 0x654   : > { %p1162_p12 = pneg %p1161_p11 }
 0x655   : > { %p1168_p3 = por %p1167_p2, %p1166_p1 }
 0x657   : > { %p1169_p4 = pnand %p1168_p3, %p1162_p12 }
 0x659   : > { %1172 = shalt.err (!%p1169_p4)
}
 0x65a   : > { %1061 = dma.vmem_to_hbm [thread:$0]  (%p1304_p5), %s1521_s22, 16, %s1519_s24, %s765_s10  }
 0x65b PF: > { %p1072_p7 = scmp.ge.s32.totalorder %s1211_s30, 2  ;;  %s807_s23 = sand.u32 1, %s1199_s27  }
 0x65c   : > { %s808_s18 = scalar_lea.sflag [#allocation3], %s807_s23 }
 0x65d   : > { %p1066_p8 = pnand %p1072_p7, %p1308_p6 }
 0x65f   : > { %1190 = dma.done.wait (!%p1066_p8), %s808_s18, 16  }
 0x660   : > { %1192 = vsyncadd (!%p1066_p8), %s808_s18, 4294967280  ;;  %s816_s9 = scalar_lea.sflag [#allocation5], %s807_s23 }
 0x661   : > { %1194 = dma.done.wait (!%p1066_p8), %s816_s9, 128  }
 0x662   : > { %1196 = vsyncadd (!%p1066_p8), %s816_s9, 4294967168  ;;  %p22_p5 = scmp.ge.s32.totalorder %s1291_s11, 4   ;;  %s1573_s27 = smov %s1203_s28 }
 0x663   : > { %s1574_s28 = smov %s1207_s29  ;;  %s1575_s29 = smov %s1302_s14 }
 0x664   : > { %s1576_s30 = smov %s1291_s11  ;;  %24 = sbr.rel (!%p22_p5) target bundleno = 5 (0x5), region = 106 }
 0x66b   :  { %821 = vsyncpa [#allocation3], 1 }
 0x66c   :  { %823 = vsyncpa [#allocation3 + $0x1], 1 }
 0x66d   :  { %824 = vsyncpa [#allocation5], 1 }
 0x66e   :  { %826 = vsyncpa [#allocation5 + $0x1], 1 }

</bundles_post_ra>
